<compile_context>
chip_gen: v7x
topology: tpu7x:2x2x1
jax: 0.10.0
libtpu: 0.0.40
codegen_flags: <defaults>
</compile_context>

<pallas_src>
import functools

import jax
import jax.numpy as jnp
import numpy as np
from jax.experimental import pallas as pl
from jax.experimental.pallas import tpu as pltpu

_LN_EPS = 1e-5          # torch.nn.LayerNorm default
_OUT_LANES = 128        # lane-dense fused output slab width (>= se_dim + pe_dim + ke_dim)


def _round_up(x, m):
    return (x + m - 1) // m * m


def _layernorm(x, gamma, beta):
    mean = jnp.mean(x, axis=-1, keepdims=True)
    var = jnp.mean(jnp.square(x - mean), axis=-1, keepdims=True)
    return (x - mean) * jax.lax.rsqrt(var + _LN_EPS) * gamma + beta


# ----------------------------------------------------------------------------
# Fused kernel: per row-tile do SE|PE masked LayerNorm, KE embed + LayerNorm, then
# accumulate both projections into one 128-lane output slab (single unmasked store).
# ----------------------------------------------------------------------------
def _fused_kernel(num_emb, d_se,
                  emb_ref,                                   # SMEM embedding table
                  sp_ref, dist_ref,                          # row-tiled inputs
                  sp_g_ref, sp_b_ref, ke_g_ref, ke_b_ref,    # resident LN params
                  wsp_ref, wke_ref, bcat_ref,                # resident padded projections
                  enc_ref, kebias_ref):                      # outputs
    # ---- SE | PE branch: one load, separate LN statistics merged via a column mask ----
    x = sp_ref[...].astype(jnp.float32)                      # (rt, d_se + d_pe)
    d_sp = x.shape[-1]
    xs, xp = x[:, :d_se], x[:, d_se:]
    mu_s = jnp.mean(xs, axis=-1, keepdims=True)
    mu_p = jnp.mean(xp, axis=-1, keepdims=True)
    rs_s = jax.lax.rsqrt(jnp.mean(jnp.square(xs - mu_s), axis=-1, keepdims=True) + _LN_EPS)
    rs_p = jax.lax.rsqrt(jnp.mean(jnp.square(xp - mu_p), axis=-1, keepdims=True) + _LN_EPS)
    is_se = jax.lax.broadcasted_iota(jnp.int32, (1, d_sp), 1) < d_se
    mu = jnp.where(is_se, mu_s, mu_p)
    rstd = jnp.where(is_se, rs_s, rs_p)
    y_sp = (x - mu) * rstd * sp_g_ref[...] + sp_b_ref[...]

    # ---- KE branch: tiny-table embedding lookup (static select chain), then LayerNorm ----
    dist = dist_ref[...].astype(jnp.int32)                   # int8 in HBM -> widen in VMEM
    bias = jnp.zeros(dist.shape, jnp.float32) + emb_ref[0]   # bucket 0 (and OOB) -> emb[0]
    for k in range(1, num_emb):                              # static, small (max_dist + 1)
        bias = jnp.where(dist == k, emb_ref[k], bias)
    kebias_ref[...] = bias
    y_ke = _layernorm(bias, ke_g_ref[...], ke_b_ref[...])

    # ---- Fused projections: both branches accumulate into one 128-wide slab ----
    out = jnp.dot(y_sp, wsp_ref[...], preferred_element_type=jnp.float32)
    out = out + jnp.dot(y_ke.astype(jnp.bfloat16), wke_ref[...],
                        preferred_element_type=jnp.float32)
    enc_ref[...] = out + bcat_ref[...]


def _choose_tiling(n_nodes, d_sp):
    """Row tile: multiple of 32 in [32, 512] (or the full row count for tiny graphs),
    solved directly from a generation-aware VMEM budget, and capped so the 'parallel'
    row grid has >= ~4 steps (so v7x's two TensorCores both get work)."""
    try:
        cap = int(pltpu.get_tpu_info().vmem_capacity_bytes)   # 128 MiB v5e/v6e, 64 MiB v7x
    except Exception:                                         # non-TPU / interpret fallback
        cap = 64 << 20
    budget = int(cap * 0.70)

    # Resident operands (constant index_map, still double-buffered by the pipeliner -> 2x).
    resident = 2 * (n_nodes * _OUT_LANES * 2       # KE projection weight (bf16)
                    + 2 * n_nodes * 4              # KE LN gamma/beta
                    + d_sp * (_OUT_LANES + 2) * 4  # stacked SE|PE weight + LN gamma/beta
                    + _OUT_LANES * 4)              # fused bias
    # Per-row streaming bytes (double buffered).
    per_row = 2 * (n_nodes * 1                     # dist tile (int8)
                   + n_nodes * 4                   # ke_bias output tile (f32)
                   + _OUT_LANES * 4                # enc slab output tile (f32)
                   + d_sp * 4)                     # se|pe input tile (f32)

    if n_nodes <= 32:
        rt = n_nodes                               # single full-row block for tiny graphs
    else:
        rt = (budget - resident) // max(per_row, 1)
        rt = max(32, min(512, rt // 32 * 32))
        rt = min(rt, max(32, _round_up(-(-n_nodes // 4), 32)))   # keep >= ~4 grid steps

    vmem_limit = int(min(resident + per_row * rt + (8 << 20), int(cap * 0.80)))
    vmem_limit = max(vmem_limit, 16 << 20)
    return rt, vmem_limit


# ----------------------------------------------------------------------------
# One-time ("cache build") parameter preparation — hoisted off the per-call path.
# ----------------------------------------------------------------------------
def prepare_feature_encoder_params(raw):
    n, d_se = raw["se_enc"].shape
    d_pe = raw["pe_enc"].shape[1]
    se_dim = raw["se_w"].shape[1]
    pe_dim = raw["pe_w"].shape[1]
    ke_dim = raw["ke_w"].shape[1]
    num_emb = raw["ke_emb"].shape[0]

    assert raw["ke_dist"].shape == (n, n)
    assert raw["ke_w"].shape[0] == n and raw["ke_gamma"].shape[-1] == n
    assert se_dim + pe_dim + ke_dim <= _OUT_LANES, "enlarge _OUT_LANES (multiple of 128)"
    assert num_emb <= 128, "int8 distance packing requires max_dist <= 127"
    assert int(jnp.max(raw["ke_dist"])) < num_emb, "distance bucket out of embedding range"

    o_se, o_pe, o_ke = 0, se_dim, se_dim + pe_dim
    w_sp = jnp.zeros((d_se + d_pe, _OUT_LANES), jnp.float32)
    w_sp = w_sp.at[:d_se, o_se:o_se + se_dim].set(raw["se_w"].astype(jnp.float32))
    w_sp = w_sp.at[d_se:, o_pe:o_pe + pe_dim].set(raw["pe_w"].astype(jnp.float32))
    w_ke = (jnp.zeros((n, _OUT_LANES), jnp.float32)
            .at[:, o_ke:o_ke + ke_dim].set(raw["ke_w"].astype(jnp.float32))
            ).astype(jnp.bfloat16)
    b_cat = (jnp.zeros((1, _OUT_LANES), jnp.float32)
             .at[:, o_se:o_se + se_dim].set(raw["se_b"].reshape(1, -1))
             .at[:, o_pe:o_pe + pe_dim].set(raw["pe_b"].reshape(1, -1))
             .at[:, o_ke:o_ke + ke_dim].set(raw["ke_b"].reshape(1, -1)))
    sp_gamma = jnp.concatenate([raw["se_gamma"].reshape(1, -1),
                                raw["pe_gamma"].reshape(1, -1)], axis=-1).astype(jnp.float32)
    sp_beta = jnp.concatenate([raw["se_beta"].reshape(1, -1),
                               raw["pe_beta"].reshape(1, -1)], axis=-1).astype(jnp.float32)

    return dict(
        se_enc=raw["se_enc"].astype(jnp.float32),
        pe_enc=raw["pe_enc"].astype(jnp.float32),
        ke_dist_i8=raw["ke_dist"].astype(jnp.int8),     # values <= max_dist: int8 is exact
        ke_emb=raw["ke_emb"].astype(jnp.float32).reshape(-1),
        sp_gamma=sp_gamma, sp_beta=sp_beta,
        ke_gamma=raw["ke_gamma"].reshape(1, -1).astype(jnp.float32),
        ke_beta=raw["ke_beta"].reshape(1, -1).astype(jnp.float32),
        w_sp=w_sp, w_ke=w_ke, b_cat=b_cat,
    )


# ----------------------------------------------------------------------------
# FeatureEncoder.forward equivalent
# ----------------------------------------------------------------------------
@functools.partial(jax.jit, static_argnames=("se_dim", "pe_dim", "ke_dim", "num_emb"))
def feature_encoder_forward(prep, seed_key, *, se_dim, pe_dim, ke_dim, num_emb):
    se_enc = prep["se_enc"]
    pe_enc = prep["pe_enc"]
    dist_i8 = prep["ke_dist_i8"]

    n, d_se = se_enc.shape
    d_pe = pe_enc.shape[1]
    d_sp = d_se + d_pe

    # Forward-time random ±1 sign per node (== torch.randint in PyTorch forward), folded
    # into the tiny PE input; SE|PE stream as one concatenated array.
    signs = (2 * jax.random.randint(seed_key, (n, 1), 0, 2) - 1).astype(jnp.float32)
    sp_enc = jnp.concatenate([se_enc, pe_enc * signs], axis=-1)      # (n, d_se + d_pe)

    rt, vmem_limit = _choose_tiling(n, d_sp)
    grid = (pl.cdiv(n, rt),)

    kernel = functools.partial(_fused_kernel, num_emb, d_se)
    res = lambda shape: pl.BlockSpec(shape, lambda i: (0, 0))        # resident operands

    enc_slab, ke_bias = pl.pallas_call(
        kernel,
        out_shape=(
            jax.ShapeDtypeStruct((n, _OUT_LANES), jnp.float32),      # fused se|pe|ke slab
            jax.ShapeDtypeStruct((n, n), jnp.float32),               # ke_bias
        ),
        grid=grid,
        in_specs=[
            pl.BlockSpec(memory_space=pltpu.MemorySpace.SMEM),       # embedding table
            pl.BlockSpec((rt, d_sp), lambda i: (i, 0)),              # se|pe rows
            pl.BlockSpec((rt, n), lambda i: (i, 0)),                 # dist rows (int8)
            res((1, d_sp)), res((1, d_sp)),                          # se|pe LN gamma/beta
            res((1, n)), res((1, n)),                                # ke LN gamma/beta
            res((d_sp, _OUT_LANES)),                                 # stacked se|pe proj (f32)
            res((n, _OUT_LANES)),                                    # padded ke proj (bf16)
            res((1, _OUT_LANES)),                                    # fused bias
        ],
        out_specs=(
            pl.BlockSpec((rt, _OUT_LANES), lambda i: (i, 0)),
            pl.BlockSpec((rt, n), lambda i: (i, 0)),
        ),
        compiler_params=pltpu.CompilerParams(
            dimension_semantics=("parallel",),     # row grid shards across v7x's 2 TCs
            vmem_limit_bytes=vmem_limit,
        ),
    )(prep["ke_emb"], sp_enc, dist_i8,
      prep["sp_gamma"], prep["sp_beta"], prep["ke_gamma"], prep["ke_beta"],
      prep["w_sp"], prep["w_ke"], prep["b_cat"])

    o_se, o_pe, o_ke = 0, se_dim, se_dim + pe_dim
    encodings = {
        "se": enc_slab[:, o_se:o_se + se_dim],
        "pe": enc_slab[:, o_pe:o_pe + pe_dim],
        "ke": enc_slab[:, o_ke:o_ke + ke_dim],
    }
    return encodings, ke_bias


# ----------------------------------------------------------------------------
# Pure-JAX reference for sanity checks
# ----------------------------------------------------------------------------
def _ref_ln_linear(x, gamma, beta, w, b):
    mean = x.mean(-1, keepdims=True)
    var = ((x - mean) ** 2).mean(-1, keepdims=True)
    xn = (x - mean) / jnp.sqrt(var + _LN_EPS)
    return (xn * gamma + beta) @ w + b


if __name__ == "__main__":
    key = jax.random.PRNGKey(0)
    keys = jax.random.split(key, 10)

    n_nodes, se_dim, pe_dim, ke_dim = 16, 8, 8, 8
    n_stats = 5                      # ('max','min','mean','mode','var') -> feature dim 6
    max_dist = 6                     # ICD tree distance range -> Embedding(max_dist+1, 1)

    # "cached" encodings (stand-ins for the torch.load'ed caches built in __init__)
    se_enc = jax.random.normal(keys[0], (n_nodes, n_stats + 1), jnp.float32)
    pe_enc = jax.random.normal(keys[1], (n_nodes, 2 * pe_dim), jnp.float32)
    ke_dist = jax.random.randint(keys[2], (n_nodes, n_nodes), 0, max_dist + 1, dtype=jnp.int32)

    def linear_params(k, d_in, d_out):
        kw, kb = jax.random.split(k)
        lim = 1.0 / np.sqrt(d_in)
        wgt = jax.random.uniform(kw, (d_in, d_out), jnp.float32, -lim, lim)
        bia = jax.random.uniform(kb, (1, d_out), jnp.float32, -lim, lim)
        return wgt, bia

    se_w, se_b = linear_params(keys[3], n_stats + 1, se_dim)
    pe_w, pe_b = linear_params(keys[4], 2 * pe_dim, pe_dim)
    ke_w, ke_b = linear_params(keys[5], n_nodes, ke_dim)
    ke_emb = jax.random.normal(keys[6], (max_dist + 1,), jnp.float32)  # nn.Embedding(max_dist+1, 1)

    raw = dict(
        se_enc=se_enc,
        se_gamma=jnp.ones((1, n_stats + 1), jnp.float32), se_beta=jnp.zeros((1, n_stats + 1), jnp.float32),
        se_w=se_w, se_b=se_b,
        pe_enc=pe_enc,
        pe_gamma=jnp.ones((1, 2 * pe_dim), jnp.float32), pe_beta=jnp.zeros((1, 2 * pe_dim), jnp.float32),
        pe_w=pe_w, pe_b=pe_b,
        ke_dist=ke_dist, ke_emb=ke_emb,
        ke_gamma=jnp.ones((1, n_nodes), jnp.float32), ke_beta=jnp.zeros((1, n_nodes), jnp.float32),
        ke_w=ke_w, ke_b=ke_b,
    )

    prep = prepare_feature_encoder_params(raw)   # one-time "cache build" preprocessing
    encodings, ke_bias = feature_encoder_forward(
        prep, keys[7], se_dim=se_dim, pe_dim=pe_dim, ke_dim=ke_dim, num_emb=max_dist + 1)
    jax.block_until_ready((encodings, ke_bias))

    # --- sanity checks against a pure-JAX reference ---
    se_ref = _ref_ln_linear(se_enc, raw["se_gamma"], raw["se_beta"], se_w, se_b)
    np.testing.assert_allclose(np.asarray(encodings["se"]), np.asarray(se_ref), rtol=2e-2, atol=2e-2)

    # PE: the ±1 sign is drawn from the same key in forward(), so the reference is exact.
    signs_ref = (2 * jax.random.randint(keys[7], (n_nodes, 1), 0, 2) - 1).astype(jnp.float32)
    pe_ref = _ref_ln_linear(pe_enc * signs_ref, raw["pe_gamma"], raw["pe_beta"], pe_w, pe_b)
    np.testing.assert_allclose(np.asarray(encodings["pe"]), np.asarray(pe_ref), rtol=2e-2, atol=2e-2)

    ke_bias_ref = ke_emb[ke_dist]
    ke_ref = _ref_ln_linear(ke_bias_ref, raw["ke_gamma"], raw["ke_beta"], ke_w, ke_b)
    np.testing.assert_allclose(np.asarray(ke_bias), np.asarray(ke_bias_ref), rtol=1e-5, atol=1e-5)
    np.testing.assert_allclose(np.asarray(encodings["ke"]), np.asarray(ke_ref), rtol=2e-2, atol=2e-2)

    print("KERNEL_OK")
</pallas_src>

<mosaic_0001>
module attributes {stable_mosaic.version = 11 : i64} {
  func.func @_fused_kernel(%arg0: i32, %arg1: memref<7xf32, #tpu.memory_space<smem>>, %arg2: memref<16x22xf32, #tpu.memory_space<vmem>>, %arg3: memref<16x16xi8, #tpu.memory_space<vmem>>, %arg4: memref<1x22xf32, #tpu.memory_space<vmem>>, %arg5: memref<1x22xf32, #tpu.memory_space<vmem>>, %arg6: memref<1x16xf32, #tpu.memory_space<vmem>>, %arg7: memref<1x16xf32, #tpu.memory_space<vmem>>, %arg8: memref<22x128xf32, #tpu.memory_space<vmem>>, %arg9: memref<16x128xbf16, #tpu.memory_space<vmem>>, %arg10: memref<1x128xf32, #tpu.memory_space<vmem>>, %arg11: memref<16x128xf32, #tpu.memory_space<vmem>>, %arg12: memref<16x16xf32, #tpu.memory_space<vmem>>) attributes {dimension_semantics = [#tpu.dimension_semantics<parallel>], iteration_bounds = array<i64: 1>, scalar_prefetch = 0 : i64, scratch_operands = 0 : i64, tpu.core_type = #tpu.core_type<tc>, window_params = [{transform_indices = @transform_0, window_bounds = array<i64: 7>}, {transform_indices = @transform_1, window_bounds = array<i64: 16, 22>}, {transform_indices = @transform_2, window_bounds = array<i64: 16, 16>}, {pipeline_mode = #tpu.pipeline_mode<synchronous>, transform_indices = @transform_3, window_bounds = array<i64: 1, 22>}, {pipeline_mode = #tpu.pipeline_mode<synchronous>, transform_indices = @transform_4, window_bounds = array<i64: 1, 22>}, {pipeline_mode = #tpu.pipeline_mode<synchronous>, transform_indices = @transform_5, window_bounds = array<i64: 1, 16>}, {pipeline_mode = #tpu.pipeline_mode<synchronous>, transform_indices = @transform_6, window_bounds = array<i64: 1, 16>}, {pipeline_mode = #tpu.pipeline_mode<synchronous>, transform_indices = @transform_7, window_bounds = array<i64: 22, 128>}, {pipeline_mode = #tpu.pipeline_mode<synchronous>, transform_indices = @transform_8, window_bounds = array<i64: 16, 128>}, {pipeline_mode = #tpu.pipeline_mode<synchronous>, transform_indices = @transform_9, window_bounds = array<i64: 1, 128>}, {transform_indices = @transform_10, window_bounds = array<i64: 16, 128>}, {transform_indices = @transform_11, window_bounds = array<i64: 16, 16>}]} {
    %c0 = arith.constant 0 : index
    %c0_0 = arith.constant 0 : index
    %0 = vector.load %arg2[%c0, %c0_0] : memref<16x22xf32, #tpu.memory_space<vmem>>, vector<16x22xf32>
    %1 = vector.extract_strided_slice %0 {offsets = [0, 0], sizes = [16, 6], strides = [1, 1]} : vector<16x22xf32> to vector<16x6xf32>
    %2 = vector.extract_strided_slice %0 {offsets = [0, 6], sizes = [16, 16], strides = [1, 1]} : vector<16x22xf32> to vector<16x16xf32>
    %cst = arith.constant dense<0.000000e+00> : vector<16xf32>
    %3 = vector.multi_reduction <add>, %1, %cst [1] : vector<16x6xf32> to vector<16xf32>
    %4 = vector.shape_cast %3 : vector<16xf32> to vector<16x1xf32>
    %cst_1 = arith.constant 6.000000e+00 : f32
    %5 = vector.broadcast %cst_1 : f32 to vector<16x1xf32>
    %6 = arith.divf %4, %5 : vector<16x1xf32>
    %cst_2 = arith.constant dense<0.000000e+00> : vector<16xf32>
    %7 = vector.multi_reduction <add>, %2, %cst_2 [1] : vector<16x16xf32> to vector<16xf32>
    %8 = vector.shape_cast %7 : vector<16xf32> to vector<16x1xf32>
    %cst_3 = arith.constant 1.600000e+01 : f32
    %9 = vector.broadcast %cst_3 : f32 to vector<16x1xf32>
    %10 = arith.divf %8, %9 : vector<16x1xf32>
    %11 = vector.broadcast %6 : vector<16x1xf32> to vector<16x6xf32>
    %12 = arith.subf %1, %11 : vector<16x6xf32>
    %13 = arith.mulf %12, %12 : vector<16x6xf32>
    %cst_4 = arith.constant dense<0.000000e+00> : vector<16xf32>
    %14 = vector.multi_reduction <add>, %13, %cst_4 [1] : vector<16x6xf32> to vector<16xf32>
    %15 = vector.shape_cast %14 : vector<16xf32> to vector<16x1xf32>
    %cst_5 = arith.constant 6.000000e+00 : f32
    %16 = vector.broadcast %cst_5 : f32 to vector<16x1xf32>
    %17 = arith.divf %15, %16 : vector<16x1xf32>
    %cst_6 = arith.constant 9.99999974E-6 : f32
    %18 = vector.broadcast %cst_6 : f32 to vector<16x1xf32>
    %19 = arith.addf %17, %18 : vector<16x1xf32>
    %20 = math.rsqrt %19 : vector<16x1xf32>
    %21 = vector.broadcast %10 : vector<16x1xf32> to vector<16x16xf32>
    %22 = arith.subf %2, %21 : vector<16x16xf32>
    %23 = arith.mulf %22, %22 : vector<16x16xf32>
    %cst_7 = arith.constant dense<0.000000e+00> : vector<16xf32>
    %24 = vector.multi_reduction <add>, %23, %cst_7 [1] : vector<16x16xf32> to vector<16xf32>
    %25 = vector.shape_cast %24 : vector<16xf32> to vector<16x1xf32>
    %cst_8 = arith.constant 1.600000e+01 : f32
    %26 = vector.broadcast %cst_8 : f32 to vector<16x1xf32>
    %27 = arith.divf %25, %26 : vector<16x1xf32>
    %cst_9 = arith.constant 9.99999974E-6 : f32
    %28 = vector.broadcast %cst_9 : f32 to vector<16x1xf32>
    %29 = arith.addf %27, %28 : vector<16x1xf32>
    %30 = math.rsqrt %29 : vector<16x1xf32>
    %31 = tpu.iota {dimensions = array<i32: 1>} : vector<1x22xi32>
    %c6_i32 = arith.constant 6 : i32
    %32 = vector.broadcast %c6_i32 : i32 to vector<1x22xi32>
    %33 = arith.cmpi slt, %31, %32 : vector<1x22xi32>
    %34 = vector.shape_cast %33 : vector<1x22xi1> to vector<1x22xi1>
    %35 = vector.broadcast %34 : vector<1x22xi1> to vector<16x22xi1>
    %36 = vector.shape_cast %6 : vector<16x1xf32> to vector<16x1xf32>
    %37 = vector.broadcast %36 : vector<16x1xf32> to vector<16x22xf32>
    %38 = vector.shape_cast %10 : vector<16x1xf32> to vector<16x1xf32>
    %39 = vector.broadcast %38 : vector<16x1xf32> to vector<16x22xf32>
    %40 = arith.select %35, %37, %39 : vector<16x22xi1>, vector<16x22xf32>
    %41 = vector.shape_cast %33 : vector<1x22xi1> to vector<1x22xi1>
    %42 = vector.broadcast %41 : vector<1x22xi1> to vector<16x22xi1>
    %43 = vector.shape_cast %20 : vector<16x1xf32> to vector<16x1xf32>
    %44 = vector.broadcast %43 : vector<16x1xf32> to vector<16x22xf32>
    %45 = vector.shape_cast %30 : vector<16x1xf32> to vector<16x1xf32>
    %46 = vector.broadcast %45 : vector<16x1xf32> to vector<16x22xf32>
    %47 = arith.select %42, %44, %46 : vector<16x22xi1>, vector<16x22xf32>
    %48 = arith.subf %0, %40 : vector<16x22xf32>
    %49 = arith.mulf %48, %47 : vector<16x22xf32>
    %c0_10 = arith.constant 0 : index
    %c0_11 = arith.constant 0 : index
    %50 = vector.load %arg4[%c0_10, %c0_11] : memref<1x22xf32, #tpu.memory_space<vmem>>, vector<1x22xf32>
    %51 = vector.broadcast %50 : vector<1x22xf32> to vector<16x22xf32>
    %52 = arith.mulf %49, %51 : vector<16x22xf32>
    %c0_12 = arith.constant 0 : index
    %c0_13 = arith.constant 0 : index
    %53 = vector.load %arg5[%c0_12, %c0_13] : memref<1x22xf32, #tpu.memory_space<vmem>>, vector<1x22xf32>
    %54 = vector.broadcast %53 : vector<1x22xf32> to vector<16x22xf32>
    %55 = arith.addf %52, %54 : vector<16x22xf32>
    %c0_14 = arith.constant 0 : index
    %c0_15 = arith.constant 0 : index
    %56 = vector.load %arg3[%c0_14, %c0_15] : memref<16x16xi8, #tpu.memory_space<vmem>>, vector<16x16xi8>
    %57 = arith.extsi %56 : vector<16x16xi8> to vector<16x16xi32>
    %cst_16 = arith.constant 0.000000e+00 : f32
    %58 = vector.broadcast %cst_16 : f32 to vector<16x16xf32>
    %c0_17 = arith.constant 0 : index
    %59 = memref.load %arg1[%c0_17] : memref<7xf32, #tpu.memory_space<smem>>
    %60 = vector.broadcast %59 : f32 to vector<16x16xf32>
    %61 = arith.addf %58, %60 : vector<16x16xf32>
    %c1_i32 = arith.constant 1 : i32
    %62 = vector.broadcast %c1_i32 : i32 to vector<16x16xi32>
    %63 = arith.cmpi eq, %57, %62 : vector<16x16xi32>
    %c1 = arith.constant 1 : index
    %64 = memref.load %arg1[%c1] : memref<7xf32, #tpu.memory_space<smem>>
    %65 = vector.broadcast %64 : f32 to vector<16x16xf32>
    %66 = arith.select %63, %65, %61 : vector<16x16xi1>, vector<16x16xf32>
    %c2_i32 = arith.constant 2 : i32
    %67 = vector.broadcast %c2_i32 : i32 to vector<16x16xi32>
    %68 = arith.cmpi eq, %57, %67 : vector<16x16xi32>
    %c2 = arith.constant 2 : index
    %69 = memref.load %arg1[%c2] : memref<7xf32, #tpu.memory_space<smem>>
    %70 = vector.broadcast %69 : f32 to vector<16x16xf32>
    %71 = arith.select %68, %70, %66 : vector<16x16xi1>, vector<16x16xf32>
    %c3_i32 = arith.constant 3 : i32
    %72 = vector.broadcast %c3_i32 : i32 to vector<16x16xi32>
    %73 = arith.cmpi eq, %57, %72 : vector<16x16xi32>
    %c3 = arith.constant 3 : index
    %74 = memref.load %arg1[%c3] : memref<7xf32, #tpu.memory_space<smem>>
    %75 = vector.broadcast %74 : f32 to vector<16x16xf32>
    %76 = arith.select %73, %75, %71 : vector<16x16xi1>, vector<16x16xf32>
    %c4_i32 = arith.constant 4 : i32
    %77 = vector.broadcast %c4_i32 : i32 to vector<16x16xi32>
    %78 = arith.cmpi eq, %57, %77 : vector<16x16xi32>
    %c4 = arith.constant 4 : index
    %79 = memref.load %arg1[%c4] : memref<7xf32, #tpu.memory_space<smem>>
    %80 = vector.broadcast %79 : f32 to vector<16x16xf32>
    %81 = arith.select %78, %80, %76 : vector<16x16xi1>, vector<16x16xf32>
    %c5_i32 = arith.constant 5 : i32
    %82 = vector.broadcast %c5_i32 : i32 to vector<16x16xi32>
    %83 = arith.cmpi eq, %57, %82 : vector<16x16xi32>
    %c5 = arith.constant 5 : index
    %84 = memref.load %arg1[%c5] : memref<7xf32, #tpu.memory_space<smem>>
    %85 = vector.broadcast %84 : f32 to vector<16x16xf32>
    %86 = arith.select %83, %85, %81 : vector<16x16xi1>, vector<16x16xf32>
    %c6_i32_18 = arith.constant 6 : i32
    %87 = vector.broadcast %c6_i32_18 : i32 to vector<16x16xi32>
    %88 = arith.cmpi eq, %57, %87 : vector<16x16xi32>
    %c6 = arith.constant 6 : index
    %89 = memref.load %arg1[%c6] : memref<7xf32, #tpu.memory_space<smem>>
    %90 = vector.broadcast %89 : f32 to vector<16x16xf32>
    %91 = arith.select %88, %90, %86 : vector<16x16xi1>, vector<16x16xf32>
    %c0_19 = arith.constant 0 : index
    %c0_20 = arith.constant 0 : index
    %92 = vector.load %arg12[%c0_19, %c0_20] : memref<16x16xf32, #tpu.memory_space<vmem>>, vector<16x16xf32>
    tpu.vector_store %arg12[%c0_19, %c0_20], %91 {strides = array<i32>} : memref<16x16xf32, #tpu.memory_space<vmem>>, vector<16x16xf32>,
    %c0_21 = arith.constant 0 : index
    %c0_22 = arith.constant 0 : index
    %93 = vector.load %arg6[%c0_21, %c0_22] : memref<1x16xf32, #tpu.memory_space<vmem>>, vector<1x16xf32>
    %c0_23 = arith.constant 0 : index
    %c0_24 = arith.constant 0 : index
    %94 = vector.load %arg7[%c0_23, %c0_24] : memref<1x16xf32, #tpu.memory_space<vmem>>, vector<1x16xf32>
    %cst_25 = arith.constant dense<0.000000e+00> : vector<16xf32>
    %95 = vector.multi_reduction <add>, %91, %cst_25 [1] : vector<16x16xf32> to vector<16xf32>
    %96 = vector.shape_cast %95 : vector<16xf32> to vector<16x1xf32>
    %cst_26 = arith.constant 1.600000e+01 : f32
    %97 = vector.broadcast %cst_26 : f32 to vector<16x1xf32>
    %98 = arith.divf %96, %97 : vector<16x1xf32>
    %99 = vector.broadcast %98 : vector<16x1xf32> to vector<16x16xf32>
    %100 = arith.subf %91, %99 : vector<16x16xf32>
    %101 = arith.mulf %100, %100 : vector<16x16xf32>
    %cst_27 = arith.constant dense<0.000000e+00> : vector<16xf32>
    %102 = vector.multi_reduction <add>, %101, %cst_27 [1] : vector<16x16xf32> to vector<16xf32>
    %103 = vector.shape_cast %102 : vector<16xf32> to vector<16x1xf32>
    %cst_28 = arith.constant 1.600000e+01 : f32
    %104 = vector.broadcast %cst_28 : f32 to vector<16x1xf32>
    %105 = arith.divf %103, %104 : vector<16x1xf32>
    %106 = vector.broadcast %98 : vector<16x1xf32> to vector<16x16xf32>
    %107 = arith.subf %91, %106 : vector<16x16xf32>
    %cst_29 = arith.constant 9.99999974E-6 : f32
    %108 = vector.broadcast %cst_29 : f32 to vector<16x1xf32>
    %109 = arith.addf %105, %108 : vector<16x1xf32>
    %110 = math.rsqrt %109 : vector<16x1xf32>
    %111 = vector.broadcast %110 : vector<16x1xf32> to vector<16x16xf32>
    %112 = arith.mulf %107, %111 : vector<16x16xf32>
    %113 = vector.broadcast %93 : vector<1x16xf32> to vector<16x16xf32>
    %114 = arith.mulf %112, %113 : vector<16x16xf32>
    %115 = vector.broadcast %94 : vector<1x16xf32> to vector<16x16xf32>
    %116 = arith.addf %114, %115 : vector<16x16xf32>
    %c0_30 = arith.constant 0 : index
    %c0_31 = arith.constant 0 : index
    %117 = vector.load %arg8[%c0_30, %c0_31] : memref<22x128xf32, #tpu.memory_space<vmem>>, vector<22x128xf32>
    %cst_32 = arith.constant dense<0.000000e+00> : vector<16x128xf32>
    %118 = tpu.matmul %55, %117, %cst_32 {dimension_numbers = #tpu.dot_dimension_numbers<[1], [0], [0], [1], [0, 0, 1, 1], [], []>} : vector<16x22xf32>, vector<22x128xf32>, vector<16x128xf32> -> vector<16x128xf32>
    %119 = arith.truncf %116 : vector<16x16xf32> to vector<16x16xbf16>
    %c0_33 = arith.constant 0 : index
    %c0_34 = arith.constant 0 : index
    %120 = vector.load %arg9[%c0_33, %c0_34] : memref<16x128xbf16, #tpu.memory_space<vmem>>, vector<16x128xbf16>
    %cst_35 = arith.constant dense<0.000000e+00> : vector<16x128xf32>
    %121 = tpu.matmul %119, %120, %cst_35 {dimension_numbers = #tpu.dot_dimension_numbers<[1], [0], [0], [1], [0, 0, 1, 1], [], []>} : vector<16x16xbf16>, vector<16x128xbf16>, vector<16x128xf32> -> vector<16x128xf32>
    %122 = arith.addf %118, %121 : vector<16x128xf32>
    %c0_36 = arith.constant 0 : index
    %c0_37 = arith.constant 0 : index
    %123 = vector.load %arg10[%c0_36, %c0_37] : memref<1x128xf32, #tpu.memory_space<vmem>>, vector<1x128xf32>
    %124 = vector.broadcast %123 : vector<1x128xf32> to vector<16x128xf32>
    %125 = arith.addf %122, %124 : vector<16x128xf32>
    %c0_38 = arith.constant 0 : index
    %c0_39 = arith.constant 0 : index
    %126 = vector.load %arg11[%c0_38, %c0_39] : memref<16x128xf32, #tpu.memory_space<vmem>>, vector<16x128xf32>
    tpu.vector_store %arg11[%c0_38, %c0_39], %125 {strides = array<i32>} : memref<16x128xf32, #tpu.memory_space<vmem>>, vector<16x128xf32>,
    return
  }
  func.func @transform_0(%arg0: i32) -> i32 {
    %c0_i32 = arith.constant 0 : i32
    %c0_i32_0 = arith.constant 0 : i32
    return %c0_i32 : i32
  }
  func.func @transform_1(%arg0: i32) -> (i32, i32) {
    %c0_i32 = arith.constant 0 : i32
    %c0_i32_0 = arith.constant 0 : i32
    return %arg0, %c0_i32 : i32, i32
  }
  func.func @transform_2(%arg0: i32) -> (i32, i32) {
    %c0_i32 = arith.constant 0 : i32
    %c0_i32_0 = arith.constant 0 : i32
    return %arg0, %c0_i32 : i32, i32
  }
  func.func @transform_3(%arg0: i32) -> (i32, i32) {
    %c0_i32 = arith.constant 0 : i32
    %c0_i32_0 = arith.constant 0 : i32
    %c0_i32_1 = arith.constant 0 : i32
    return %c0_i32, %c0_i32_0 : i32, i32
  }
  func.func @transform_4(%arg0: i32) -> (i32, i32) {
    %c0_i32 = arith.constant 0 : i32
    %c0_i32_0 = arith.constant 0 : i32
    %c0_i32_1 = arith.constant 0 : i32
    return %c0_i32, %c0_i32_0 : i32, i32
  }
  func.func @transform_5(%arg0: i32) -> (i32, i32) {
    %c0_i32 = arith.constant 0 : i32
    %c0_i32_0 = arith.constant 0 : i32
    %c0_i32_1 = arith.constant 0 : i32
    return %c0_i32, %c0_i32_0 : i32, i32
  }
  func.func @transform_6(%arg0: i32) -> (i32, i32) {
    %c0_i32 = arith.constant 0 : i32
    %c0_i32_0 = arith.constant 0 : i32
    %c0_i32_1 = arith.constant 0 : i32
    return %c0_i32, %c0_i32_0 : i32, i32
  }
  func.func @transform_7(%arg0: i32) -> (i32, i32) {
    %c0_i32 = arith.constant 0 : i32
    %c0_i32_0 = arith.constant 0 : i32
    %c0_i32_1 = arith.constant 0 : i32
    return %c0_i32, %c0_i32_0 : i32, i32
  }
  func.func @transform_8(%arg0: i32) -> (i32, i32) {
    %c0_i32 = arith.constant 0 : i32
    %c0_i32_0 = arith.constant 0 : i32
    %c0_i32_1 = arith.constant 0 : i32
    return %c0_i32, %c0_i32_0 : i32, i32
  }
  func.func @transform_9(%arg0: i32) -> (i32, i32) {
    %c0_i32 = arith.constant 0 : i32
    %c0_i32_0 = arith.constant 0 : i32
    %c0_i32_1 = arith.constant 0 : i32
    return %c0_i32, %c0_i32_0 : i32, i32
  }
  func.func @transform_10(%arg0: i32) -> (i32, i32) {
    %c0_i32 = arith.constant 0 : i32
    %c0_i32_0 = arith.constant 0 : i32
    return %arg0, %c0_i32 : i32, i32
  }
  func.func @transform_11(%arg0: i32) -> (i32, i32) {
    %c0_i32 = arith.constant 0 : i32
    %c0_i32_0 = arith.constant 0 : i32
    return %arg0, %c0_i32 : i32, i32
  }
}

</mosaic_0001>

<bundles_post_ra>
// kernel: feature_encoder_forward.1
= control target key start
LH: loop header
LB: loop body
LE: loop exit
PB: predicated region body
PF: predicated region fallthrough
CT: control target
= control target key end

     0   :  { %17 = vsyncpa [#allocation4], 0  ;;  %s710_s0 = inlined_call_operand.vmem [shape: f32[7], index: 0, kind: input, shape index: {}]   ;;  %s711_s1 = inlined_call_operand.vmem [shape: f32[16,22], index: 1, kind: input, shape index: {}]   ;;  %s712_s2 = inlined_call_operand.vmem [shape: s8[16,16], index: 2, kind: input, shape index: {}]   ;;  %s713_s3 = inlined_call_operand.vmem [shape: f32[1,22], index: 3, kind: input, shape index: {}]   ;;  %s714_s4 = inlined_call_operand.vmem [shape: f32[1,22], index: 4, kind: input, shape index: {}]   ;;  %s715_s5 = inlined_call_operand.vmem [shape: f32[1,16], index: 5, kind: input, shape index: {}]   ;;  %s716_s6 = inlined_call_operand.vmem [shape: f32[1,16], index: 6, kind: input, shape index: {}]   ;;  %s717_s7 = inlined_call_operand.vmem [shape: f32[22,128], index: 7, kind: input, shape index: {}]   ;;  %s718_s8 = inlined_call_operand.vmem [shape: bf16[16,128], index: 8, kind: input, shape index: {}]   ;;  %s719_s9 = inlined_call_operand.vmem [shape: f32[1,128], index: 9, kind: input, shape index: {}]   ;;  %s720_s10 = inlined_call_operand.vmem [shape: f32[16,128], index: 10, kind: output, shape index: {0}]   ;;  %s721_s11 = inlined_call_operand.hbm [shape: f32[16,16], index: 11, kind: output, shape index: {1}]  }
   0x1   :  { %18 = vsyncpa [#allocation3], 0  ;;  %s25_s19 = sshll.u32 %s710_s0, 4  ;;  %s26_s19 = int_to_ptr.vmem [resolvable:$true] %s25_s19 }
   0x2   :  { %s482_s20 = scalar_lea.vmem %s26_s19, 16  ;;  %p487_p1 = scmp.lt.s32.totalorder %s26_s19, %s26_s19 }
   0x3   :  { %p483_p0 = scmp.ne.s32.totalorder %s26_s19, %s482_s20  ;;  %p488_p2 = scmp.lt.s32.totalorder %s482_s20, %s482_s20 }
   0x5   :  { %p489_p3 = por %p488_p2, %p487_p1 }
   0x7   :  { %p490_p4 = pnand %p489_p3, %p483_p0 }
   0x9   :  { %493 = shalt.err (!%p490_p4)
}
   0xa   :  { %s520_s21 = smov [#allocation2]  }
   0xb   :  { %28 = dma.vmem_to_smem %s26_s19, 16, %s520_s21, [#allocation4]  }
   0xc   :  { %516 = dma.done.wait [#allocation4], 16  }
   0xd   :  { %517 = vsyncadd [#allocation4], 4294967280 }
   0xe   :  { %50 = sfence }
   0xf   :  { %v593_v0 = vld [vmem:[%s711_s1] sm:$0xff]  ;;  %s521_s25 = smov 122   ;;  %s157_s26 = sld [smem:[#allocation2]]  ;;  %v603_v4 = vld [vmem:[%s711_s1 + $0x8] sm:$0xff]  ;;  %vm72_vm12 = vcmask 130048   ;;  %vm54_vm13 = vcmask 48128   ;;  %v122_v41 = vlaneseq }
  0x10   :  { %v433_v1 = vld [vmem:[%s712_s2] sm:$0xf]   ;;  %66 = vrot.lane.b32.xlu0 %v593_v0, %s521_s25  ;;  %s418_s27 = sld [smem:[#allocation2 + $0x1]]  ;;  %s419_s30 = sld [smem:[#allocation2 + $0x2]]  ;;  %v55_v30 = vsel %vm54_vm13, %v593_v0, 0.0  ;;  %v58_v31 = vsel %vm54_vm13, %v603_v4, 0.0 }
  0x11   :  { %v434_v2 = vunpack.c.0.s8 %v433_v1  ;;  %v435_v3 = vunpack.c.1.s8 %v433_v1  ;;  %s420_s12 = sld [smem:[#allocation2 + $0x3]]  ;;  %s421_s13 = sld [smem:[#allocation2 + $0x4]]  ;;  %v636_v46 = vand.u32 127, %v122_v41  ;;  %v469_v1 = vld [vmem:[%s718_s8] sm:$0xff]   ;;  %vm523_vm15 = vmmov 0  }
  0x12   :  { %s422_s14 = sld [smem:[#allocation2 + $0x5]]  ;;  %s605_s15 = sld [smem:[#allocation2 + $0x6]] }
  0x13   :  { %vm160_vm0 = vcmp.eq.s32.totalorder %v434_v2, 1  ;;  %vm166_vm1 = vcmp.eq.s32.totalorder %v434_v2, 2  ;;  %vm172_vm2 = vcmp.eq.s32.totalorder %v434_v2, 3  ;;  %vm178_vm3 = vcmp.eq.s32.totalorder %v434_v2, 4 }
  0x14   :  { %68 = vrot.lane.b32.xlu0 %v603_v4, %s521_s25  ;;  %vm161_vm4 = vcmp.eq.s32.totalorder %v435_v3, 1  ;;  %vm184_vm5 = vcmp.eq.s32.totalorder %v434_v2, 5  ;;  %vm190_vm6 = vcmp.eq.s32.totalorder %v434_v2, 6  ;;  %vm167_vm7 = vcmp.eq.s32.totalorder %v435_v3, 2 }
  0x15   :  { %vm173_vm8 = vcmp.eq.s32.totalorder %v435_v3, 3  ;;  %v158_v5 = vstv %s157_s26  ;;  %vm179_vm9 = vcmp.eq.s32.totalorder %v435_v3, 4  ;;  %vm185_vm10 = vcmp.eq.s32.totalorder %v435_v3, 5 }
  0x16   :  { %v163_v6 = vstv %s418_s27  ;;  %v169_v8 = vstv %s419_s30  ;;  %vm191_vm11 = vcmp.eq.s32.totalorder %v435_v3, 6  ;;  %vm124_vm14 = vcmp.lt.s32.totalorder %v636_v46, 6 }
  0x17   :  { %v164_v7 = vsel %vm160_vm0, %v163_v6, %v158_v5  ;;  %v175_v9 = vstv %s420_s12  ;;  %v165_v10 = vsel %vm161_vm4, %v163_v6, %v158_v5  ;;  %v181_v12 = vstv %s421_s13 }
  0x18   :  { %v170_v11 = vsel %vm166_vm1, %v169_v8, %v164_v7  ;;  %v171_v13 = vsel %vm167_vm7, %v169_v8, %v165_v10  ;;  %v187_v15 = vstv %s422_s14  ;;  %v193_v16 = vstv %s605_s15  ;;  %v242_v8 = vld [vmem:[%s717_s7] sm:$0xff] }
  0x19   :  { %v176_v14 = vsel %vm172_vm2, %v175_v9, %v170_v11  ;;  %v177_v17 = vsel %vm173_vm8, %v175_v9, %v171_v13  ;;  %v522_v2 = vmov 0.0   ;;  %v243_v9 = vld [vmem:[%s717_s7 + $0x8] sm:$0xff]  ;;  %v244_v11 = vld [vmem:[%s717_s7 + $0x10] sm:$0x3f]  ;;  %vm305_vm0 = vcmask 1045504  }
  0x1a   :  { %v182_v18 = vsel %vm178_vm3, %v181_v12, %v176_v14  ;;  %v183_v19 = vsel %vm179_vm9, %v181_v12, %v177_v17  ;;  %443 = vmatprep.subr.bf16.mxu0 %v522_v2  ;;  %445 = vmatprep.mubr.msk.bf16.mxu0 %vm523_vm15, %v522_v2  ;;  %v458_v10 = vpack.c.bf16 %v243_v9, %v242_v8  ;;  %vm298_vm1 = vcmask 179200  }
  0x1b   :  { %v188_v20 = vsel %vm184_vm5, %v187_v15, %v182_v18  ;;  %v189_v21 = vsel %vm185_vm10, %v187_v15, %v183_v19  ;;  %444 = vmatpush3.bf16.msra.mxu0 %v469_v1 }
  0x1c   :  { %v194_v22 = vsel %vm190_vm6, %v193_v16, %v188_v20  ;;  %v195_v23 = vsel %vm191_vm11, %v193_v16, %v189_v21  ;;  %459 = vmatprep.subr.bf16.mxu1 %v458_v10  ;;  %v424_v20 = vld [vmem:[%s715_s5] ss:$0 sm:$0xff] }
  0x1d   :  { %196 = vst.msk [vmem:[#allocation5] sm:$0xff] %vm72_vm12, %v194_v22  ;;  %197 = vst.msk [vmem:[#allocation5 + $0x8] sm:$0xff] %vm72_vm12, %v195_v23  ;;  %v200_v24 = vsel %vm72_vm12, %v194_v22, 0.0  ;;  %v203_v29 = vsel %vm72_vm12, %v195_v23, 0.0  ;;  %461 = vmatpush3.bf16.msra.mxu1 %v458_v10 }
  0x1e   :  { %453 = vmatprep.subr.msk.mxu1 %vm305_vm0, %v244_v11 }
  0x21   :  { %454 = vmatpush3.msk.msra.mxu1 %vm305_vm0, %v244_v11 }
  0x33   :  { %201 = vadd.xlane.f32.xlu0 %v200_v24  ;;  %v425_v24 = vld [vmem:[%s716_s6] ss:$0 sm:$0xff] }
  0x82   :  { %v67_v25 = vpop.permute.xlu0 %66 }
  0x83   :  { %v73_v26 = vsel %vm72_vm12, %v67_v25, 0.0 }
  0x84   :  { %74 = vadd.xlane.f32.xlu1 %v73_v26 }
  0x86   :  { %v69_v27 = vpop.permute.xlu0 %68 }
  0x87   :  { %v76_v28 = vsel %vm72_vm12, %v69_v27, 0.0 }
  0x88   :  { %77 = vadd.xlane.f32.xlu1 %v76_v28 }
  0x8c   :  { %204 = vadd.xlane.f32.xlu1 %v203_v29 }
  0x90   :  { %56 = vadd.xlane.f32.xlu1 %v55_v30 }
  0x94   :  { %59 = vadd.xlane.f32.xlu1 %v58_v31 }
  0xc0   :  { %v202_v32 = vpop.xlane.xlu0 %201 }
  0xc1   :  { %v206_v33 = vmul.f32 0.0625, %v202_v32 }
  0xc3   :  { %v628_v34 = vsub.f32 %v194_v22, %v206_v33 }
  0xc5   :  { %v210_v35 = vmul.f32 %v628_v34, %v628_v34 }
  0xc7   :  { %v212_v36 = vsel %vm72_vm12, %v210_v35, 0.0 }
  0xc8   :  { %213 = vadd.xlane.f32.xlu0 %v212_v36 }
 0x111   :  { %v75_v37 = vpop.xlane.xlu1 %74 }
 0x112   :  { %v80_v38 = vmul.f32 0.0625, %v75_v37 }
 0x114   :  { %v98_v39 = vsub.f32 %v593_v0, %v80_v38 }
 0x115   :  { %v78_v40 = vpop.xlane.xlu1 %77 }
 0x116   :  { %v100_v42 = vmul.f32 %v98_v39, %v98_v39  ;;  %v81_v43 = vmul.f32 0.0625, %v78_v40 }
 0x118   :  { %v99_v44 = vsub.f32 %v603_v4, %v81_v43  ;;  %104 = vrot.lane.b32.xlu1 %v100_v42, %s521_s25 }
 0x119   :  { %v205_v45 = vpop.xlane.xlu1 %204 }
 0x11a   :  { %v101_v47 = vmul.f32 %v99_v44, %v99_v44  ;;  %v207_v60 = vmul.f32 0.0625, %v205_v45  ;;  %v416_v45 = vld [vmem:[%s713_s3] ss:$0 sm:$0xff]  ;;  %s524_s3 = smov [#allocation5]  }
 0x11c   :  { %106 = vrot.lane.b32.xlu1 %v101_v47, %s521_s25  ;;  %v209_v61 = vsub.f32 %v195_v23, %v207_v60  ;;  %s402_s25 = sshll.u32 %s524_s3, 4  ;;  %s403_s25 = int_to_ptr.vmem [resolvable:$true] %s402_s25 }
 0x11d   :  { %v57_v48 = vpop.xlane.xlu1 %56  ;;  %s494_s26 = scalar_lea.vmem %s403_s25, 256  ;;  %p499_p6 = scmp.lt.s32.totalorder %s403_s25, %s403_s25 }
 0x11e   :  { %v62_v49 = vmul.f32 0.16666667, %v57_v48  ;;  %v211_v62 = vmul.f32 %v209_v61, %v209_v61  ;;  %p495_p5 = scmp.ne.s32.totalorder %s403_s25, %s494_s26  ;;  %p500_p7 = scmp.lt.s32.totalorder %s494_s26, %s494_s26 }
 0x120   :  { %v82_v50 = vsub.f32 %v593_v0, %v62_v49  ;;  %v643_v51 = vsel %vm124_vm14, %v62_v49, %v80_v38  ;;  %v215_v63 = vsel %vm72_vm12, %v211_v62, 0.0  ;;  %v417_v49 = vld [vmem:[%s714_s4] ss:$0 sm:$0xff]  ;;  %p501_p8 = por %p500_p7, %p499_p6 }
 0x121   :  { %v60_v52 = vpop.xlane.xlu1 %59 }
 0x122   :  { %v63_v53 = vmul.f32 0.16666667, %v60_v52  ;;  %v84_v54 = vmul.f32 %v82_v50, %v82_v50  ;;  %p502_p9 = pnand %p501_p8, %p495_p5 }
 0x124   :  { %v83_v55 = vsub.f32 %v603_v4, %v63_v53  ;;  %v648_v56 = vsel %vm124_vm14, %v63_v53, %v81_v43  ;;  %v86_v57 = vsel %vm54_vm13, %v84_v54, 0.0  ;;  %v131_v43 = vsub.f32 %v593_v0, %v643_v51 }
 0x125   :  { %87 = vadd.xlane.f32.xlu0 %v86_v57  ;;  %v132_v52 = vsub.f32 %v603_v4, %v648_v56 }
 0x126   :  { %v85_v58 = vmul.f32 %v83_v55, %v83_v55 }
 0x128   :  { %v89_v59 = vsel %vm54_vm13, %v85_v58, 0.0 }
 0x129   :  { %90 = vadd.xlane.f32.xlu0 %v89_v59 }
 0x140   :  { %216 = vadd.xlane.f32.xlu1 %v215_v63 }
 0x155   :  { %v214_v12 = vpop.xlane.xlu0 %213 }
 0x156   :  { %v218_v13 = vmul.f32 0.0625, %v214_v12 }
 0x158   :  { %v220_v14 = vadd.f32 1e-05, %v218_v13 }
 0x15a   :  { %470 = vrsqrt.f32 %v220_v14 }
 0x164   :  { %v471_v18 = vpop.eup %470 }
 0x165   :  { %v224_v19 = vmul.f32 %v471_v18, %v628_v34 }
 0x167   :  { %v232_v23 = vmul.f32 %v424_v20, %v224_v19 }
 0x169   :  { %v240_v26 = vadd.f32 %v425_v24, %v232_v23 }
 0x18a   :  { %v105_v3 = vpop.permute.xlu1 %104 }
 0x18b   :  { %v110_v5 = vsel %vm72_vm12, %v105_v3, 0.0 }
 0x18c   :  { %111 = vadd.xlane.f32.xlu0 %v110_v5 }
 0x18e   :  { %v107_v6 = vpop.permute.xlu1 %106 }
 0x18f   :  { %v113_v7 = vsel %vm72_vm12, %v107_v6, 0.0 }
 0x190   :  { %114 = vadd.xlane.f32.xlu0 %v113_v7 }
 0x1b2   :  { %v88_v29 = vpop.xlane.xlu0 %87 }
 0x1b3   :  { %v92_v31 = vmul.f32 0.16666667, %v88_v29 }
 0x1b5   :  { %v94_v32 = vadd.f32 1e-05, %v92_v31 }
 0x1b6   :  { %v91_v30 = vpop.xlane.xlu0 %90 }
 0x1b7   :  { %v93_v33 = vmul.f32 0.16666667, %v91_v30 }
 0x1b9   :  { %v95_v37 = vadd.f32 1e-05, %v93_v33 }
 0x1cd   :  { %v217_v15 = vpop.xlane.xlu1 %216 }
 0x1ce   :  { %v219_v16 = vmul.f32 0.0625, %v217_v15 }
 0x1d0   :  { %v221_v17 = vadd.f32 1e-05, %v219_v16 }
 0x1d2   :  { %472 = vrsqrt.f32 %v221_v17 }
 0x1d3   :  { %474 = vrsqrt.f32 %v94_v32 }
 0x1dc   :  { %v473_v21 = vpop.eup %472 }
 0x1dd   :  { %v225_v22 = vmul.f32 %v473_v21, %v209_v61  ;;  %v475_v41 = vpop.eup %474 }
 0x1df   :  { %v233_v25 = vmul.f32 %v424_v20, %v225_v22 }
 0x1e1   :  { %v241_v27 = vadd.f32 %v425_v24, %v233_v25 }
 0x1e3   :  { %v245_v28 = vpack.c.bf16 %v241_v27, %v240_v26 }
 0x1e5   :  { %446 = vmatmul.mubr.msk.bf16.vlgmr.msra.gmra.mrb[0].mxu0 %vm72_vm12, %v245_v28 }
 0x219   :  { %v112_v34 = vpop.xlane.xlu0 %111 }
 0x21a   :  { %v116_v35 = vmul.f32 0.0625, %v112_v34 }
 0x21c   :  { %v118_v36 = vadd.f32 1e-05, %v116_v35 }
 0x21d   :  { %v115_v38 = vpop.xlane.xlu0 %114 }
 0x21e   :  { %476 = vrsqrt.f32 %v118_v36  ;;  %v117_v39 = vmul.f32 0.0625, %v115_v38 }
 0x21f   :  { %478 = vrsqrt.f32 %v95_v37 }
 0x220   :  { %v119_v40 = vadd.f32 1e-05, %v117_v39 }
 0x222   :  { %480 = vrsqrt.f32 %v119_v40 }
 0x228   :  { %v477_v42 = vpop.eup %476 }
 0x229   :  { %v129_v44 = vsel %vm124_vm14, %v475_v41, %v477_v42  ;;  %v479_v48 = vpop.eup %478 }
 0x22a   :  { %v133_v47 = vmul.f32 %v131_v43, %v129_v44 }
 0x22c   :  { %v481_v50 = vpop.eup %480  ;;  %v142_v53 = vmul.f32 %v416_v45, %v133_v47 }
 0x22d   :  { %v130_v0 = vsel %vm124_vm14, %v479_v48, %v481_v50 }
 0x22e   :  { %v134_v51 = vmul.f32 %v132_v52, %v130_v0  ;;  %v151_v54 = vadd.f32 %v417_v49, %v142_v53 }
 0x230   :  { %v143_v55 = vmul.f32 %v416_v45, %v134_v51  ;;  %455 = vmatprep.mubr.msk.f32.mxu1 %vm298_vm1, %v151_v54 }
 0x232   :  { %v152_v57 = vadd.f32 %v417_v49, %v143_v55 }
 0x234   :  { %456 = vmatmul.mubr.msk.f32.vlgmr.msra.gmra.mrb[0].mxu1 %vm298_vm1, %v152_v57 }
 0x235   :  { %505 = shalt.err (!%p502_p9)
}
 0x236   :  { %s506_s28 = scalar_lea.hbm %s721_s11, 256 }
 0x237   :  { %p507_p10 = scmp.ne.s32.totalorder %s721_s11, %s506_s28  ;;  %p510_p11 = scmp.lt.u32.totalorder %s506_s28, %s721_s11 }
 0x239   :  { %p512_p12 = pnand %p510_p11, %p507_p10 }
 0x23b   :  { %515 = shalt.err (!%p512_p12)
}
 0x23c   :  { %s525_s14 = smov 128   ;;  %s526_s15 = smov 8   ;;  %v431_v60 = vld [vmem:[%s719_s9] ss:$0 sm:$0xff] }
 0x23d   :  { %408 = dma.vmem_to_hbm [thread:$0]  %s403_s25, 256, %s721_s11, [#allocation3], %s525_s14, %s525_s14, %s526_s15  }
 0x2b8   :  { %v291_v4 = vpop.f32.mrb[0].mxu0 }
 0x2b9   :  { %v447_v46 = vpop.f32.mrb[1].mxu0 }
 0x2ba   :  { %v294_v56 = vpop.f32.mrb[2].mxu0 }
 0x2bb   :  { %v448_v58 = vpop.f32.mrb[3].mxu0 }
 0x307   :  { %v457_v59 = vpop.f32.mrb[0].mxu1 }
 0x308   :  { %v381_v61 = vadd.f32 %v457_v59, %v294_v56  ;;  %v375_v62 = vpop.f32.mrb[1].mxu1 }
 0x309   :  { %v376_v63 = vadd.f32 %v375_v62, %v291_v4 }
 0x30a   :  { %v392_v1 = vadd.f32 %v431_v60, %v381_v61 }
 0x30b   :  { %v391_v2 = vadd.f32 %v431_v60, %v376_v63 }
 0x30c   :  { %394 = vst [vmem:[%s720_s10 + $0x8] sm:$0xff] %v392_v1 }
 0x30d   :  { %393 = vst [vmem:[%s720_s10] sm:$0xff] %v391_v2 }
 0x30e   :  { %518 = dma.done.wait [#allocation3], 256  }
 0x30f   :  { %519 = vsyncadd [#allocation3], 4294967040 }
 0x310   :  { %414 = vsyncpa [#allocation3], 1 }
 0x311   :  { %415 = vsyncpa [#allocation4], 1 }

</bundles_post_ra>
